<compile_context>
chip_gen: v5e
topology: v5e:2x2
jax: 0.10.0
libtpu: 0.0.40
codegen_flags: <defaults>
</compile_context>

<pallas_src>
import functools

import jax
import jax.numpy as jnp
from jax.experimental import pallas as pl
from jax.experimental.pallas import tpu as pltpu

BN_EPS = 1e-5
MATMUL_DTYPE = jnp.bfloat16          # MXU operand dtype (f32 accumulation)
LANE = 128
SUBLANE = 8
VMEM_LIMIT_BYTES = 32 * 1024 * 1024  # explicit scoped-VMEM limit (v7x-safe)


def _round_up(n, m):
    return ((n + m - 1) // m) * m


def _pad2(a, rows, cols):
    r, c = a.shape
    return jnp.pad(a, ((0, rows - r), (0, cols - c)))


# ---------------------------------------------------------------------------
# Fused single-tile kernel: full forward pass (layer1 + in-kernel BN stats +
# folded BN affine + encoder/decoder tail).  Used when the padded batch fits
# in one VMEM tile.
# ---------------------------------------------------------------------------
def _fused_kernel(x_ref, gamma_ref, beta_ref,
                  w1_ref, b1_ref, w2_ref, b2_ref, w3_ref, b3_ref,
                  w4_ref, b4_ref, w5_ref, b5_ref, w6_ref, b6_ref,
                  recon_ref, emb_ref, *, batch):
    dt = w1_ref.dtype

    h = jnp.dot(x_ref[...], w1_ref[...], preferred_element_type=jnp.float32)
    h = jnp.maximum(h + b1_ref[...], 0.0)

    # Training-mode BatchNorm1d: batch mean, biased variance.  Zero-padded
    # batch rows must be excluded (ReLU(b1) != 0 on those rows).
    row = jax.lax.broadcasted_iota(jnp.int32, h.shape, 0)
    hm = jnp.where(row < batch, h, 0.0)
    inv_n = jnp.float32(1.0 / batch)
    mean = jnp.sum(hm, axis=0, keepdims=True) * inv_n
    var = jnp.sum(hm * hm, axis=0, keepdims=True) * inv_n - mean * mean
    scale = gamma_ref[...] * jax.lax.rsqrt(var + BN_EPS)
    shift = beta_ref[...] - mean * scale
    h = h * scale + shift                      # folded BN affine (f32)

    h = jnp.dot(h.astype(dt), w2_ref[...], preferred_element_type=jnp.float32)
    h = jnp.maximum(h + b2_ref[...], 0.0)

    emb = jnp.dot(h.astype(dt), w3_ref[...], preferred_element_type=jnp.float32)
    emb = emb + b3_ref[...]
    emb_ref[...] = emb

    d = jnp.dot(emb.astype(dt), w4_ref[...], preferred_element_type=jnp.float32)
    d = jnp.maximum(d + b4_ref[...], 0.0)
    d = jnp.dot(d.astype(dt), w5_ref[...], preferred_element_type=jnp.float32)
    d = jnp.maximum(d + b5_ref[...], 0.0)
    recon = jnp.dot(d.astype(dt), w6_ref[...], preferred_element_type=jnp.float32)
    recon_ref[...] = recon + b6_ref[...]


# ---------------------------------------------------------------------------
# Large-batch kernel 1: Linear(F,128) + ReLU, plus per-feature sum / sum-sq
# for the BatchNorm statistics, accumulated across batch tiles.
# ---------------------------------------------------------------------------
def _enc_layer1_kernel(x_ref, w1_ref, b1_ref, h1_ref, sums_ref, *,
                       batch, block_rows):
    i = pl.program_id(0)

    h = jnp.dot(x_ref[...], w1_ref[...], preferred_element_type=jnp.float32)
    h = jnp.maximum(h + b1_ref[...], 0.0)
    h1_ref[...] = h

    # Exclude zero-padded batch rows from the statistics (ReLU(b1) != 0).
    row = jax.lax.broadcasted_iota(jnp.int32, h.shape, 0) + i * block_rows
    hm = jnp.where(row < batch, h, 0.0)
    tile_sums = jnp.concatenate(
        [jnp.sum(hm, axis=0, keepdims=True),
         jnp.sum(hm * hm, axis=0, keepdims=True)],
        axis=0)  # (2, 128): [sum; sum_sq]

    @pl.when(i == 0)
    def _init():
        sums_ref[...] = jnp.zeros_like(sums_ref)

    sums_ref[...] += tile_sums


# ---------------------------------------------------------------------------
# Large-batch kernel 2: folded BatchNorm affine + Linear(128,64)/ReLU +
# Linear(64,32) (embeddings) + decoder Linear(32,64)/ReLU +
# Linear(64,128)/ReLU + Linear(128,F).  32-wide dims padded to 128.
# ---------------------------------------------------------------------------
def _bn_mlp_kernel(h1_ref, scale_ref, shift_ref,
                   w2_ref, b2_ref, w3_ref, b3_ref,
                   w4_ref, b4_ref, w5_ref, b5_ref,
                   w6_ref, b6_ref,
                   recon_ref, emb_ref):
    dt = w2_ref.dtype

    # BatchNorm folded into a single multiply-add (f32 elementwise).
    h = h1_ref[...] * scale_ref[...] + shift_ref[...]

    h = jnp.dot(h.astype(dt), w2_ref[...], preferred_element_type=jnp.float32)
    h = jnp.maximum(h + b2_ref[...], 0.0)

    emb = jnp.dot(h.astype(dt), w3_ref[...], preferred_element_type=jnp.float32)
    emb = emb + b3_ref[...]
    emb_ref[...] = emb

    d = jnp.dot(emb.astype(dt), w4_ref[...], preferred_element_type=jnp.float32)
    d = jnp.maximum(d + b4_ref[...], 0.0)
    d = jnp.dot(d.astype(dt), w5_ref[...], preferred_element_type=jnp.float32)
    d = jnp.maximum(d + b5_ref[...], 0.0)
    recon = jnp.dot(d.astype(dt), w6_ref[...], preferred_element_type=jnp.float32)
    recon_ref[...] = recon + b6_ref[...]


# ---------------------------------------------------------------------------
# Wrapper
# ---------------------------------------------------------------------------
def autoencoder_forward(x, params, gamma, beta, *, block_rows=512,
                        fused_max_rows=2048):
    B, F = x.shape
    (w1, b1), (w2, b2), (w3, b3), (w4, b4), (w5, b5), (w6, b6) = params

    F_pad = _round_up(F, LANE)
    dt = MATMUL_DTYPE

    # Zero-pad narrow dims to lane-dense widths; cast matmul operands to bf16.
    w1_p = _pad2(w1, F_pad, 128).astype(dt)
    w2_p = w2.astype(dt)
    w3_p = _pad2(w3, 64, 128).astype(dt)      # bottleneck cols 32 -> 128
    b3_p = _pad2(b3, 1, 128)
    w4_p = _pad2(w4, 128, 64).astype(dt)      # bottleneck rows 32 -> 128
    w5_p = w5.astype(dt)
    w6_p = _pad2(w6, 128, F_pad).astype(dt)
    b6_p = _pad2(b6, 1, F_pad)

    const = lambda *_: (0, 0)
    row_tile = lambda i: (i, 0)

    def full_spec(arr):
        return pl.BlockSpec(arr.shape, const)   # resident, DMA'd once

    total_flops = 2 * (F_pad * 128 + 128 * 64 + 64 * 128 + 128 * 64
                       + 64 * 128 + 128 * F_pad)
    w_bytes = sum(int(a.size) * a.dtype.itemsize
                  for a in (w1_p, w2_p, w3_p, w4_p, w5_p, w6_p))

    # ---- fused single-tile fast path ---------------------------------------
    b_small = _round_up(B, SUBLANE)
    if b_small <= fused_max_rows:
        x_p = _pad2(x, b_small, F_pad).astype(dt)
        cost = pl.CostEstimate(
            flops=b_small * total_flops,
            transcendentals=0,
            bytes_accessed=(x_p.size * 2 + w_bytes
                            + b_small * F_pad * 4 + b_small * 128 * 4))
        recon_p, emb_p = pl.pallas_call(
            functools.partial(_fused_kernel, batch=B),
            grid=(1,),
            in_specs=[
                pl.BlockSpec((b_small, F_pad), const),
                full_spec(gamma), full_spec(beta),
                full_spec(w1_p), full_spec(b1),
                full_spec(w2_p), full_spec(b2),
                full_spec(w3_p), full_spec(b3_p),
                full_spec(w4_p), full_spec(b4),
                full_spec(w5_p), full_spec(b5),
                full_spec(w6_p), full_spec(b6_p),
            ],
            out_specs=(
                pl.BlockSpec((b_small, F_pad), const),
                pl.BlockSpec((b_small, 128), const),
            ),
            out_shape=(
                jax.ShapeDtypeStruct((b_small, F_pad), jnp.float32),
                jax.ShapeDtypeStruct((b_small, 128), jnp.float32),
            ),
            compiler_params=pltpu.CompilerParams(
                dimension_semantics=("arbitrary",),
                vmem_limit_bytes=VMEM_LIMIT_BYTES),
            cost_estimate=cost,
        )(x_p, gamma, beta, w1_p, b1, w2_p, b2, w3_p, b3_p,
          w4_p, b4, w5_p, b5, w6_p, b6_p)
        return recon_p[:B, :F], emb_p[:B, :32]

    # ---- large-batch two-phase path ----------------------------------------
    bm = _round_up(min(block_rows, B), SUBLANE)
    b_pad = _round_up(B, bm)
    nt = b_pad // bm
    x_p = _pad2(x, b_pad, F_pad).astype(dt)

    # phase 1: layer-1 + BN statistics
    cost1 = pl.CostEstimate(
        flops=2 * b_pad * F_pad * 128,
        transcendentals=0,
        bytes_accessed=(x_p.size * 2 + w1_p.size * 2 + b1.size * 4
                        + b_pad * 128 * 4 + 2 * 128 * 4))
    h1, sums = pl.pallas_call(
        functools.partial(_enc_layer1_kernel, batch=B, block_rows=bm),
        grid=(nt,),
        in_specs=[
            pl.BlockSpec((bm, F_pad), row_tile),
            full_spec(w1_p),
            full_spec(b1),
        ],
        out_specs=(
            pl.BlockSpec((bm, 128), row_tile),
            pl.BlockSpec((2, 128), const),       # resident stats accumulator
        ),
        out_shape=(
            jax.ShapeDtypeStruct((b_pad, 128), jnp.float32),
            jax.ShapeDtypeStruct((2, 128), jnp.float32),
        ),
        compiler_params=pltpu.CompilerParams(
            dimension_semantics=("arbitrary",),   # sequential accumulation
            vmem_limit_bytes=VMEM_LIMIT_BYTES),
        cost_estimate=cost1,
    )(x_p, w1_p, b1)

    # Fold training-mode BatchNorm (batch mean, biased variance) into a single
    # scale/shift — tiny (1,128) ops outside the kernel.
    mean = sums[0:1, :] / B
    var = sums[1:2, :] / B - mean * mean
    scale = gamma * jax.lax.rsqrt(var + BN_EPS)
    shift = beta - mean * scale

    # phase 2: BN affine + rest of encoder/decoder
    w_bytes2 = sum(int(a.size) * a.dtype.itemsize
                   for a in (w2_p, w3_p, w4_p, w5_p, w6_p))
    cost2 = pl.CostEstimate(
        flops=2 * b_pad * (128 * 64 + 64 * 128 + 128 * 64 + 64 * 128
                           + 128 * F_pad),
        transcendentals=0,
        bytes_accessed=(b_pad * 128 * 4 + w_bytes2
                        + b_pad * F_pad * 4 + b_pad * 128 * 4))
    recon_p, emb_p = pl.pallas_call(
        _bn_mlp_kernel,
        grid=(nt,),
        in_specs=[
            pl.BlockSpec((bm, 128), row_tile),
            full_spec(scale), full_spec(shift),
            full_spec(w2_p), full_spec(b2),
            full_spec(w3_p), full_spec(b3_p),
            full_spec(w4_p), full_spec(b4),
            full_spec(w5_p), full_spec(b5),
            full_spec(w6_p), full_spec(b6_p),
        ],
        out_specs=(
            pl.BlockSpec((bm, F_pad), row_tile),
            pl.BlockSpec((bm, 128), row_tile),
        ),
        out_shape=(
            jax.ShapeDtypeStruct((b_pad, F_pad), jnp.float32),
            jax.ShapeDtypeStruct((b_pad, 128), jnp.float32),
        ),
        compiler_params=pltpu.CompilerParams(
            dimension_semantics=("parallel",),    # batch-parallel (megacore)
            vmem_limit_bytes=VMEM_LIMIT_BYTES),
        cost_estimate=cost2,
    )(h1, scale, shift, w2_p, b2, w3_p, b3_p, w4_p, b4, w5_p, b5, w6_p, b6_p)

    # Slice off the zero padding (batch rows, feature/bottleneck cols).
    return recon_p[:B, :F], emb_p[:B, :32]


# ---------------------------------------------------------------------------
# Parameter init + pure-JAX reference
# ---------------------------------------------------------------------------
def init_params(key, input_dim):
    """Linear weights stored as (in, out) (transposed vs torch's (out, in)),
    U(-1/sqrt(in), 1/sqrt(in)) like torch's default; BN gamma=1, beta=0."""
    dims = [(input_dim, 128), (128, 64), (64, 32),
            (32, 64), (64, 128), (128, input_dim)]
    params = []
    for fan_in, fan_out in dims:
        key, kw, kb = jax.random.split(key, 3)
        bound = 1.0 / float(fan_in) ** 0.5
        w = jax.random.uniform(kw, (fan_in, fan_out), jnp.float32, -bound, bound)
        b = jax.random.uniform(kb, (1, fan_out), jnp.float32, -bound, bound)
        params.append((w, b))
    gamma = jnp.ones((1, 128), jnp.float32)
    beta = jnp.zeros((1, 128), jnp.float32)
    return params, gamma, beta


def reference_forward(x, params, gamma, beta, matmul_dtype=jnp.float32):
    """Pure-JAX reference (same matmul-operand dtype as the kernel)."""
    (w1, b1), (w2, b2), (w3, b3), (w4, b4), (w5, b5), (w6, b6) = params

    def mm(a, w):
        return jnp.dot(a.astype(matmul_dtype), w.astype(matmul_dtype),
                       preferred_element_type=jnp.float32)

    h = jnp.maximum(mm(x, w1) + b1, 0.0)
    mean = jnp.mean(h, axis=0, keepdims=True)
    var = jnp.mean((h - mean) ** 2, axis=0, keepdims=True)
    h = (h - mean) * jax.lax.rsqrt(var + BN_EPS) * gamma + beta
    h = jnp.maximum(mm(h, w2) + b2, 0.0)
    emb = mm(h, w3) + b3
    d = jnp.maximum(mm(emb, w4) + b4, 0.0)
    d = jnp.maximum(mm(d, w5) + b5, 0.0)
    recon = mm(d, w6) + b6
    return recon, emb


if __name__ == "__main__":
    INPUT_DIM = 16   # stands in for preprocessor.transform(data).shape[1]
    BATCH = 24       # deliberately not a tile multiple: exercises row masking

    key = jax.random.PRNGKey(0)
    key, kx, kp = jax.random.split(key, 3)
    x = jax.random.normal(kx, (BATCH, INPUT_DIM), jnp.float32)
    params, gamma, beta = init_params(kp, INPUT_DIM)

    recon_ref, emb_ref = reference_forward(x, params, gamma, beta,
                                           matmul_dtype=MATMUL_DTYPE)

    # Path 1: fused single-tile kernel (default for small batches).
    fwd_fused = jax.jit(autoencoder_forward)
    recon, emb = fwd_fused(x, params, gamma, beta)
    jax.block_until_ready((recon, emb))
    assert recon.shape == (BATCH, INPUT_DIM) and emb.shape == (BATCH, 32)
    assert jnp.allclose(recon, recon_ref, atol=2e-3, rtol=2e-3)
    assert jnp.allclose(emb, emb_ref, atol=2e-3, rtol=2e-3)

    # Path 2: two-phase tiled kernels (block_rows=16 forces a 2-tile grid at
    # this small batch, exercising the BN accumulation + padded-row masking).
    fwd_tiled = jax.jit(functools.partial(
        autoencoder_forward, block_rows=16, fused_max_rows=0))
    recon2, emb2 = fwd_tiled(x, params, gamma, beta)
    jax.block_until_ready((recon2, emb2))
    assert recon2.shape == (BATCH, INPUT_DIM) and emb2.shape == (BATCH, 32)
    assert jnp.allclose(recon2, recon_ref, atol=2e-3, rtol=2e-3)
    assert jnp.allclose(emb2, emb_ref, atol=2e-3, rtol=2e-3)

    print("KERNEL_OK")
</pallas_src>

<mosaic_0001>
module attributes {stable_mosaic.version = 11 : i64} {
  func.func @_fused_kernel(%arg0: i32, %arg1: memref<24x128xbf16, #tpu.memory_space<vmem>>, %arg2: memref<1x128xf32, #tpu.memory_space<vmem>>, %arg3: memref<1x128xf32, #tpu.memory_space<vmem>>, %arg4: memref<128x128xbf16, #tpu.memory_space<vmem>>, %arg5: memref<1x128xf32, #tpu.memory_space<vmem>>, %arg6: memref<128x64xbf16, #tpu.memory_space<vmem>>, %arg7: memref<1x64xf32, #tpu.memory_space<vmem>>, %arg8: memref<64x128xbf16, #tpu.memory_space<vmem>>, %arg9: memref<1x128xf32, #tpu.memory_space<vmem>>, %arg10: memref<128x64xbf16, #tpu.memory_space<vmem>>, %arg11: memref<1x64xf32, #tpu.memory_space<vmem>>, %arg12: memref<64x128xbf16, #tpu.memory_space<vmem>>, %arg13: memref<1x128xf32, #tpu.memory_space<vmem>>, %arg14: memref<128x128xbf16, #tpu.memory_space<vmem>>, %arg15: memref<1x128xf32, #tpu.memory_space<vmem>>, %arg16: memref<24x128xf32, #tpu.memory_space<vmem>>, %arg17: memref<24x128xf32, #tpu.memory_space<vmem>>) attributes {dimension_semantics = [#tpu.dimension_semantics<arbitrary>], iteration_bounds = array<i64: 1>, scalar_prefetch = 0 : i64, scratch_operands = 0 : i64, tpu.core_type = #tpu.core_type<tc>, window_params = [{pipeline_mode = #tpu.pipeline_mode<synchronous>, transform_indices = @transform_0, window_bounds = array<i64: 24, 128>}, {pipeline_mode = #tpu.pipeline_mode<synchronous>, transform_indices = @transform_1, window_bounds = array<i64: 1, 128>}, {pipeline_mode = #tpu.pipeline_mode<synchronous>, transform_indices = @transform_2, window_bounds = array<i64: 1, 128>}, {pipeline_mode = #tpu.pipeline_mode<synchronous>, transform_indices = @transform_3, window_bounds = array<i64: 128, 128>}, {pipeline_mode = #tpu.pipeline_mode<synchronous>, transform_indices = @transform_4, window_bounds = array<i64: 1, 128>}, {pipeline_mode = #tpu.pipeline_mode<synchronous>, transform_indices = @transform_5, window_bounds = array<i64: 128, 64>}, {pipeline_mode = #tpu.pipeline_mode<synchronous>, transform_indices = @transform_6, window_bounds = array<i64: 1, 64>}, {pipeline_mode = #tpu.pipeline_mode<synchronous>, transform_indices = @transform_7, window_bounds = array<i64: 64, 128>}, {pipeline_mode = #tpu.pipeline_mode<synchronous>, transform_indices = @transform_8, window_bounds = array<i64: 1, 128>}, {pipeline_mode = #tpu.pipeline_mode<synchronous>, transform_indices = @transform_9, window_bounds = array<i64: 128, 64>}, {pipeline_mode = #tpu.pipeline_mode<synchronous>, transform_indices = @transform_10, window_bounds = array<i64: 1, 64>}, {pipeline_mode = #tpu.pipeline_mode<synchronous>, transform_indices = @transform_11, window_bounds = array<i64: 64, 128>}, {pipeline_mode = #tpu.pipeline_mode<synchronous>, transform_indices = @transform_12, window_bounds = array<i64: 1, 128>}, {pipeline_mode = #tpu.pipeline_mode<synchronous>, transform_indices = @transform_13, window_bounds = array<i64: 128, 128>}, {pipeline_mode = #tpu.pipeline_mode<synchronous>, transform_indices = @transform_14, window_bounds = array<i64: 1, 128>}, {pipeline_mode = #tpu.pipeline_mode<synchronous>, transform_indices = @transform_15, window_bounds = array<i64: 24, 128>}, {pipeline_mode = #tpu.pipeline_mode<synchronous>, transform_indices = @transform_16, window_bounds = array<i64: 24, 128>}]} {
    %c0 = arith.constant 0 : index
    %c0_0 = arith.constant 0 : index
    %0 = vector.load %arg1[%c0, %c0_0] : memref<24x128xbf16, #tpu.memory_space<vmem>>, vector<24x128xbf16>
    %c0_1 = arith.constant 0 : index
    %c0_2 = arith.constant 0 : index
    %1 = vector.load %arg4[%c0_1, %c0_2] : memref<128x128xbf16, #tpu.memory_space<vmem>>, vector<128x128xbf16>
    %cst = arith.constant dense<0.000000e+00> : vector<24x128xf32>
    %2 = tpu.matmul %0, %1, %cst {dimension_numbers = #tpu.dot_dimension_numbers<[1], [0], [0], [1], [0, 0, 1, 1], [], []>} : vector<24x128xbf16>, vector<128x128xbf16>, vector<24x128xf32> -> vector<24x128xf32>
    %c0_3 = arith.constant 0 : index
    %c0_4 = arith.constant 0 : index
    %3 = vector.load %arg5[%c0_3, %c0_4] : memref<1x128xf32, #tpu.memory_space<vmem>>, vector<1x128xf32>
    %4 = vector.broadcast %3 : vector<1x128xf32> to vector<24x128xf32>
    %5 = arith.addf %2, %4 : vector<24x128xf32>
    %cst_5 = arith.constant 0.000000e+00 : f32
    %6 = vector.broadcast %cst_5 : f32 to vector<24x128xf32>
    %7 = arith.maximumf %5, %6 : vector<24x128xf32>
    %8 = tpu.iota {dimensions = array<i32: 0>} : vector<24x128xi32>
    %c24_i32 = arith.constant 24 : i32
    %9 = vector.broadcast %c24_i32 : i32 to vector<24x128xi32>
    %10 = arith.cmpi slt, %8, %9 : vector<24x128xi32>
    %cst_6 = arith.constant 0.000000e+00 : f32
    %11 = vector.broadcast %cst_6 : f32 to vector<24x128xf32>
    %12 = arith.select %10, %7, %11 : vector<24x128xi1>, vector<24x128xf32>
    %cst_7 = arith.constant dense<0.000000e+00> : vector<128xf32>
    %13 = vector.multi_reduction <add>, %12, %cst_7 [0] : vector<24x128xf32> to vector<128xf32>
    %14 = vector.shape_cast %13 : vector<128xf32> to vector<1x128xf32>
    %cst_8 = arith.constant 0.0416666679 : f32
    %15 = vector.broadcast %cst_8 : f32 to vector<1x128xf32>
    %16 = arith.mulf %14, %15 : vector<1x128xf32>
    %17 = arith.mulf %12, %12 : vector<24x128xf32>
    %cst_9 = arith.constant dense<0.000000e+00> : vector<128xf32>
    %18 = vector.multi_reduction <add>, %17, %cst_9 [0] : vector<24x128xf32> to vector<128xf32>
    %19 = vector.shape_cast %18 : vector<128xf32> to vector<1x128xf32>
    %cst_10 = arith.constant 0.0416666679 : f32
    %20 = vector.broadcast %cst_10 : f32 to vector<1x128xf32>
    %21 = arith.mulf %19, %20 : vector<1x128xf32>
    %22 = arith.mulf %16, %16 : vector<1x128xf32>
    %23 = arith.subf %21, %22 : vector<1x128xf32>
    %c0_11 = arith.constant 0 : index
    %c0_12 = arith.constant 0 : index
    %24 = vector.load %arg2[%c0_11, %c0_12] : memref<1x128xf32, #tpu.memory_space<vmem>>, vector<1x128xf32>
    %cst_13 = arith.constant 9.99999974E-6 : f32
    %25 = vector.broadcast %cst_13 : f32 to vector<1x128xf32>
    %26 = arith.addf %23, %25 : vector<1x128xf32>
    %27 = math.rsqrt %26 : vector<1x128xf32>
    %28 = arith.mulf %24, %27 : vector<1x128xf32>
    %c0_14 = arith.constant 0 : index
    %c0_15 = arith.constant 0 : index
    %29 = vector.load %arg3[%c0_14, %c0_15] : memref<1x128xf32, #tpu.memory_space<vmem>>, vector<1x128xf32>
    %30 = arith.mulf %16, %28 : vector<1x128xf32>
    %31 = arith.subf %29, %30 : vector<1x128xf32>
    %32 = vector.broadcast %28 : vector<1x128xf32> to vector<24x128xf32>
    %33 = arith.mulf %7, %32 : vector<24x128xf32>
    %34 = vector.broadcast %31 : vector<1x128xf32> to vector<24x128xf32>
    %35 = arith.addf %33, %34 : vector<24x128xf32>
    %36 = arith.truncf %35 : vector<24x128xf32> to vector<24x128xbf16>
    %c0_16 = arith.constant 0 : index
    %c0_17 = arith.constant 0 : index
    %37 = vector.load %arg6[%c0_16, %c0_17] : memref<128x64xbf16, #tpu.memory_space<vmem>>, vector<128x64xbf16>
    %cst_18 = arith.constant dense<0.000000e+00> : vector<24x64xf32>
    %38 = tpu.matmul %36, %37, %cst_18 {dimension_numbers = #tpu.dot_dimension_numbers<[1], [0], [0], [1], [0, 0, 1, 1], [], []>} : vector<24x128xbf16>, vector<128x64xbf16>, vector<24x64xf32> -> vector<24x64xf32>
    %c0_19 = arith.constant 0 : index
    %c0_20 = arith.constant 0 : index
    %39 = vector.load %arg7[%c0_19, %c0_20] : memref<1x64xf32, #tpu.memory_space<vmem>>, vector<1x64xf32>
    %40 = vector.broadcast %39 : vector<1x64xf32> to vector<24x64xf32>
    %41 = arith.addf %38, %40 : vector<24x64xf32>
    %cst_21 = arith.constant 0.000000e+00 : f32
    %42 = vector.broadcast %cst_21 : f32 to vector<24x64xf32>
    %43 = arith.maximumf %41, %42 : vector<24x64xf32>
    %44 = arith.truncf %43 : vector<24x64xf32> to vector<24x64xbf16>
    %c0_22 = arith.constant 0 : index
    %c0_23 = arith.constant 0 : index
    %45 = vector.load %arg8[%c0_22, %c0_23] : memref<64x128xbf16, #tpu.memory_space<vmem>>, vector<64x128xbf16>
    %cst_24 = arith.constant dense<0.000000e+00> : vector<24x128xf32>
    %46 = tpu.matmul %44, %45, %cst_24 {dimension_numbers = #tpu.dot_dimension_numbers<[1], [0], [0], [1], [0, 0, 1, 1], [], []>} : vector<24x64xbf16>, vector<64x128xbf16>, vector<24x128xf32> -> vector<24x128xf32>
    %c0_25 = arith.constant 0 : index
    %c0_26 = arith.constant 0 : index
    %47 = vector.load %arg9[%c0_25, %c0_26] : memref<1x128xf32, #tpu.memory_space<vmem>>, vector<1x128xf32>
    %48 = vector.broadcast %47 : vector<1x128xf32> to vector<24x128xf32>
    %49 = arith.addf %46, %48 : vector<24x128xf32>
    %c0_27 = arith.constant 0 : index
    %c0_28 = arith.constant 0 : index
    %50 = vector.load %arg17[%c0_27, %c0_28] : memref<24x128xf32, #tpu.memory_space<vmem>>, vector<24x128xf32>
    tpu.vector_store %arg17[%c0_27, %c0_28], %49 {strides = array<i32>} : memref<24x128xf32, #tpu.memory_space<vmem>>, vector<24x128xf32>,
    %51 = arith.truncf %49 : vector<24x128xf32> to vector<24x128xbf16>
    %c0_29 = arith.constant 0 : index
    %c0_30 = arith.constant 0 : index
    %52 = vector.load %arg10[%c0_29, %c0_30] : memref<128x64xbf16, #tpu.memory_space<vmem>>, vector<128x64xbf16>
    %cst_31 = arith.constant dense<0.000000e+00> : vector<24x64xf32>
    %53 = tpu.matmul %51, %52, %cst_31 {dimension_numbers = #tpu.dot_dimension_numbers<[1], [0], [0], [1], [0, 0, 1, 1], [], []>} : vector<24x128xbf16>, vector<128x64xbf16>, vector<24x64xf32> -> vector<24x64xf32>
    %c0_32 = arith.constant 0 : index
    %c0_33 = arith.constant 0 : index
    %54 = vector.load %arg11[%c0_32, %c0_33] : memref<1x64xf32, #tpu.memory_space<vmem>>, vector<1x64xf32>
    %55 = vector.broadcast %54 : vector<1x64xf32> to vector<24x64xf32>
    %56 = arith.addf %53, %55 : vector<24x64xf32>
    %cst_34 = arith.constant 0.000000e+00 : f32
    %57 = vector.broadcast %cst_34 : f32 to vector<24x64xf32>
    %58 = arith.maximumf %56, %57 : vector<24x64xf32>
    %59 = arith.truncf %58 : vector<24x64xf32> to vector<24x64xbf16>
    %c0_35 = arith.constant 0 : index
    %c0_36 = arith.constant 0 : index
    %60 = vector.load %arg12[%c0_35, %c0_36] : memref<64x128xbf16, #tpu.memory_space<vmem>>, vector<64x128xbf16>
    %cst_37 = arith.constant dense<0.000000e+00> : vector<24x128xf32>
    %61 = tpu.matmul %59, %60, %cst_37 {dimension_numbers = #tpu.dot_dimension_numbers<[1], [0], [0], [1], [0, 0, 1, 1], [], []>} : vector<24x64xbf16>, vector<64x128xbf16>, vector<24x128xf32> -> vector<24x128xf32>
    %c0_38 = arith.constant 0 : index
    %c0_39 = arith.constant 0 : index
    %62 = vector.load %arg13[%c0_38, %c0_39] : memref<1x128xf32, #tpu.memory_space<vmem>>, vector<1x128xf32>
    %63 = vector.broadcast %62 : vector<1x128xf32> to vector<24x128xf32>
    %64 = arith.addf %61, %63 : vector<24x128xf32>
    %cst_40 = arith.constant 0.000000e+00 : f32
    %65 = vector.broadcast %cst_40 : f32 to vector<24x128xf32>
    %66 = arith.maximumf %64, %65 : vector<24x128xf32>
    %67 = arith.truncf %66 : vector<24x128xf32> to vector<24x128xbf16>
    %c0_41 = arith.constant 0 : index
    %c0_42 = arith.constant 0 : index
    %68 = vector.load %arg14[%c0_41, %c0_42] : memref<128x128xbf16, #tpu.memory_space<vmem>>, vector<128x128xbf16>
    %cst_43 = arith.constant dense<0.000000e+00> : vector<24x128xf32>
    %69 = tpu.matmul %67, %68, %cst_43 {dimension_numbers = #tpu.dot_dimension_numbers<[1], [0], [0], [1], [0, 0, 1, 1], [], []>} : vector<24x128xbf16>, vector<128x128xbf16>, vector<24x128xf32> -> vector<24x128xf32>
    %c0_44 = arith.constant 0 : index
    %c0_45 = arith.constant 0 : index
    %70 = vector.load %arg15[%c0_44, %c0_45] : memref<1x128xf32, #tpu.memory_space<vmem>>, vector<1x128xf32>
    %71 = vector.broadcast %70 : vector<1x128xf32> to vector<24x128xf32>
    %72 = arith.addf %69, %71 : vector<24x128xf32>
    %c0_46 = arith.constant 0 : index
    %c0_47 = arith.constant 0 : index
    %73 = vector.load %arg16[%c0_46, %c0_47] : memref<24x128xf32, #tpu.memory_space<vmem>>, vector<24x128xf32>
    tpu.vector_store %arg16[%c0_46, %c0_47], %72 {strides = array<i32>} : memref<24x128xf32, #tpu.memory_space<vmem>>, vector<24x128xf32>,
    return
  }
  func.func @transform_0(%arg0: i32) -> (i32, i32) {
    %c0_i32 = arith.constant 0 : i32
    %c0_i32_0 = arith.constant 0 : i32
    %c0_i32_1 = arith.constant 0 : i32
    return %c0_i32, %c0_i32_0 : i32, i32
  }
  func.func @transform_1(%arg0: i32) -> (i32, i32) {
    %c0_i32 = arith.constant 0 : i32
    %c0_i32_0 = arith.constant 0 : i32
    %c0_i32_1 = arith.constant 0 : i32
    return %c0_i32, %c0_i32_0 : i32, i32
  }
  func.func @transform_2(%arg0: i32) -> (i32, i32) {
    %c0_i32 = arith.constant 0 : i32
    %c0_i32_0 = arith.constant 0 : i32
    %c0_i32_1 = arith.constant 0 : i32
    return %c0_i32, %c0_i32_0 : i32, i32
  }
  func.func @transform_3(%arg0: i32) -> (i32, i32) {
    %c0_i32 = arith.constant 0 : i32
    %c0_i32_0 = arith.constant 0 : i32
    %c0_i32_1 = arith.constant 0 : i32
    return %c0_i32, %c0_i32_0 : i32, i32
  }
  func.func @transform_4(%arg0: i32) -> (i32, i32) {
    %c0_i32 = arith.constant 0 : i32
    %c0_i32_0 = arith.constant 0 : i32
    %c0_i32_1 = arith.constant 0 : i32
    return %c0_i32, %c0_i32_0 : i32, i32
  }
  func.func @transform_5(%arg0: i32) -> (i32, i32) {
    %c0_i32 = arith.constant 0 : i32
    %c0_i32_0 = arith.constant 0 : i32
    %c0_i32_1 = arith.constant 0 : i32
    return %c0_i32, %c0_i32_0 : i32, i32
  }
  func.func @transform_6(%arg0: i32) -> (i32, i32) {
    %c0_i32 = arith.constant 0 : i32
    %c0_i32_0 = arith.constant 0 : i32
    %c0_i32_1 = arith.constant 0 : i32
    return %c0_i32, %c0_i32_0 : i32, i32
  }
  func.func @transform_7(%arg0: i32) -> (i32, i32) {
    %c0_i32 = arith.constant 0 : i32
    %c0_i32_0 = arith.constant 0 : i32
    %c0_i32_1 = arith.constant 0 : i32
    return %c0_i32, %c0_i32_0 : i32, i32
  }
  func.func @transform_8(%arg0: i32) -> (i32, i32) {
    %c0_i32 = arith.constant 0 : i32
    %c0_i32_0 = arith.constant 0 : i32
    %c0_i32_1 = arith.constant 0 : i32
    return %c0_i32, %c0_i32_0 : i32, i32
  }
  func.func @transform_9(%arg0: i32) -> (i32, i32) {
    %c0_i32 = arith.constant 0 : i32
    %c0_i32_0 = arith.constant 0 : i32
    %c0_i32_1 = arith.constant 0 : i32
    return %c0_i32, %c0_i32_0 : i32, i32
  }
  func.func @transform_10(%arg0: i32) -> (i32, i32) {
    %c0_i32 = arith.constant 0 : i32
    %c0_i32_0 = arith.constant 0 : i32
    %c0_i32_1 = arith.constant 0 : i32
    return %c0_i32, %c0_i32_0 : i32, i32
  }
  func.func @transform_11(%arg0: i32) -> (i32, i32) {
    %c0_i32 = arith.constant 0 : i32
    %c0_i32_0 = arith.constant 0 : i32
    %c0_i32_1 = arith.constant 0 : i32
    return %c0_i32, %c0_i32_0 : i32, i32
  }
  func.func @transform_12(%arg0: i32) -> (i32, i32) {
    %c0_i32 = arith.constant 0 : i32
    %c0_i32_0 = arith.constant 0 : i32
    %c0_i32_1 = arith.constant 0 : i32
    return %c0_i32, %c0_i32_0 : i32, i32
  }
  func.func @transform_13(%arg0: i32) -> (i32, i32) {
    %c0_i32 = arith.constant 0 : i32
    %c0_i32_0 = arith.constant 0 : i32
    %c0_i32_1 = arith.constant 0 : i32
    return %c0_i32, %c0_i32_0 : i32, i32
  }
  func.func @transform_14(%arg0: i32) -> (i32, i32) {
    %c0_i32 = arith.constant 0 : i32
    %c0_i32_0 = arith.constant 0 : i32
    %c0_i32_1 = arith.constant 0 : i32
    return %c0_i32, %c0_i32_0 : i32, i32
  }
  func.func @transform_15(%arg0: i32) -> (i32, i32) {
    %c0_i32 = arith.constant 0 : i32
    %c0_i32_0 = arith.constant 0 : i32
    %c0_i32_1 = arith.constant 0 : i32
    return %c0_i32, %c0_i32_0 : i32, i32
  }
  func.func @transform_16(%arg0: i32) -> (i32, i32) {
    %c0_i32 = arith.constant 0 : i32
    %c0_i32_0 = arith.constant 0 : i32
    %c0_i32_1 = arith.constant 0 : i32
    return %c0_i32, %c0_i32_0 : i32, i32
  }
}

</mosaic_0001>

<bundles_post_ra>
// kernel: autoencoder_forward.1
= control target key start
LH: loop header
LB: loop body
LE: loop exit
PB: predicated region body
PF: predicated region fallthrough
CT: control target
= control target key end

     0   :  { %s1151_s0 = inlined_call_operand.vmem [shape: bf16[24,128], index: 0, kind: input, shape index: {}]   ;;  %s1152_s1 = inlined_call_operand.vmem [shape: f32[1,128], index: 1, kind: input, shape index: {}]   ;;  %s1153_s2 = inlined_call_operand.vmem [shape: f32[1,128], index: 2, kind: input, shape index: {}]   ;;  %s1154_s3 = inlined_call_operand.vmem [shape: bf16[128,128], index: 3, kind: input, shape index: {}]   ;;  %s1155_s4 = inlined_call_operand.vmem [shape: f32[1,128], index: 4, kind: input, shape index: {}]   ;;  %s1156_s5 = inlined_call_operand.vmem [shape: bf16[128,64], index: 5, kind: input, shape index: {}]   ;;  %s1157_s6 = inlined_call_operand.vmem [shape: f32[1,64], index: 6, kind: input, shape index: {}]   ;;  %s1158_s7 = inlined_call_operand.vmem [shape: bf16[64,128], index: 7, kind: input, shape index: {}]   ;;  %s1159_s8 = inlined_call_operand.vmem [shape: f32[1,128], index: 8, kind: input, shape index: {}]   ;;  %s1160_s9 = inlined_call_operand.vmem [shape: bf16[128,64], index: 9, kind: input, shape index: {}]   ;;  %s1161_s10 = inlined_call_operand.vmem [shape: f32[1,64], index: 10, kind: input, shape index: {}]   ;;  %s1162_s11 = inlined_call_operand.vmem [shape: bf16[64,128], index: 11, kind: input, shape index: {}]   ;;  %s1163_s12 = inlined_call_operand.vmem [shape: f32[1,128], index: 12, kind: input, shape index: {}]   ;;  %s1164_s13 = inlined_call_operand.vmem [shape: bf16[128,128], index: 13, kind: input, shape index: {}]   ;;  %s1165_s14 = inlined_call_operand.vmem [shape: f32[1,128], index: 14, kind: input, shape index: {}]   ;;  %s1166_s15 = inlined_call_operand.vmem [shape: f32[24,128], index: 15, kind: output, shape index: {0}]   ;;  %s1167_s16 = inlined_call_operand.hbm [shape: f32[24,128], index: 16, kind: output, shape index: {1}]  }
   0x1   :  { %1169 = sst [smem:[#allocation5_spill]] %s1151_s0 }
   0x2   :  { %v819_v0 = vld [vmem:[%s1154_s3 + $0x38] sm:$0xff]  ;;  %v818_v1 = vld [vmem:[%s1154_s3 + $0x30] sm:$0xff] }
   0x3   :  { %135 = vmatpush.bf16.msra.mxu0 %v819_v0 }
   0x4   :  { %22 = vsyncpa [#allocation3], 0  ;;  %v817_v2 = vld [vmem:[%s1154_s3 + $0x28] sm:$0xff]  ;;  %v816_v3 = vld [vmem:[%s1154_s3 + $0x20] sm:$0xff]  ;;  %s1170_s24 = sld [smem:[#allocation5_spill]]  ;;  %vm346_vm3 = vcmask 523264  }
   0x5   :  { %v815_v4 = vld [vmem:[%s1154_s3 + $0x18] sm:$0xff]  ;;  %v814_v5 = vld [vmem:[%s1154_s3 + $0x10] sm:$0xff]  ;;  %v813_v6 = vld [vmem:[%s1154_s3 + $0x8] sm:$0xff] }
   0x6   :  { %v812_v7 = vld [vmem:[%s1154_s3] sm:$0xff]  ;;  %v827_v15 = vld [vmem:[%s1156_s5 + $0x38] sm:$0xff]  ;;  %v826_v18 = vld [vmem:[%s1156_s5 + $0x30] sm:$0xff] }
   0x7   :  { %136 = vmatpush.bf16.msra.mxu0 %v818_v1  ;;  %v863_v13 = vld [vmem:[%s1155_s4] ss:$0 sm:$0xff]  ;;  %287 = vmatpush.bf16.msra.mxu1 %v827_v15  ;;  %v825_v22 = vld [vmem:[%s1156_s5 + $0x28] sm:$0xff]  ;;  %v823_v32 = vld [vmem:[%s1156_s5 + $0x18] sm:$0xff] }
   0x8   :  { %v824_v25 = vld [vmem:[%s1156_s5 + $0x20] sm:$0xff]  ;;  %v822_v38 = vld [vmem:[%s1156_s5 + $0x10] sm:$0xff]  ;;  %v821_v43 = vld [vmem:[%s1156_s5 + $0x8] sm:$0xff] }
   0x9   :  { %v820_v48 = vld [vmem:[%s1156_s5] sm:$0xff]  ;;  %v829_v15 = vld [vmem:[%s1158_s7 + $0x8] sm:$0xff] }
   0xa   :  { %v811_v8 = vld [vmem:[%s1170_s24] sm:$0xff]  ;;  %v56_v9 = vld [vmem:[%s1170_s24 + $0x8] sm:$0xf] }
   0xb   :  { %137 = vmatpush.bf16.msra.mxu0 %v817_v2  ;;  %v82_v10 = vunpack.c.l.b16 %v56_v9  ;;  %288 = vmatpush.bf16.msra.mxu1 %v826_v18  ;;  %v189_v60 = vld [vmem:[%s1152_s1] sm:$0x1] }
   0xc   :  { %v202_v0 = vld [vmem:[%s1153_s2] sm:$0x1] }
   0xd   :  { %v84_v11 = vpack.c.b16 %v82_v10, %v82_v10 }
   0xf   :  { %138 = vmatpush.bf16.msra.mxu0 %v816_v3  ;;  %289 = vmatpush.bf16.msra.mxu1 %v825_v22 }
  0x13   :  { %139 = vmatpush.bf16.msra.mxu0 %v815_v4  ;;  %290 = vmatpush.bf16.msra.mxu1 %v824_v25  ;;  %v836_v25 = vld [vmem:[%s1160_s9 + $0x20] sm:$0xff] }
  0x17   :  { %140 = vmatpush.bf16.msra.mxu0 %v814_v5  ;;  %291 = vmatpush.bf16.msra.mxu1 %v823_v32 }
  0x1b   :  { %141 = vmatpush.bf16.msra.mxu0 %v813_v6  ;;  %292 = vmatpush.bf16.msra.mxu1 %v822_v38  ;;  %v865_v38 = vld [vmem:[%s1159_s8] ss:$0 sm:$0xff]  ;;  %s899_s8 = smov 8  }
  0x1f   :  { %142 = vmatpush.bf16.msra.mxu0 %v812_v7  ;;  %293 = vmatpush.bf16.msra.mxu1 %v821_v43  ;;  %v841_v43 = vld [vmem:[%s1162_s11 + $0x8] sm:$0xff] }
  0x22   :  { %143 = vmatmul.bf16.vlgmr.msra.gmra.mxu0 %v811_v8 }
  0x23   :  { %294 = vmatpush.bf16.msra.mxu1 %v820_v48 }
  0x32   :  { %148 = vmatmul.bf16.gmra.mxu0 %v84_v11 }
  0x9f   :  { %v144_v12 = vpop.f32.mrf.mxu0 }
  0xa0   :  { %v145_v17 = vadd.f32 %v863_v13, %v144_v12 }
  0xa2   :  { %v153_v20 = vmax.f32 %v145_v17, 0.0  ;;  %v839_v17 = vld [vmem:[%s1160_s9 + $0x38] sm:$0xff] }
  0xa3   :  { %444 = vmatpush.bf16.msra.mxu3 %v839_v17 }
  0xa4   :  { %v175_v26 = vmul.f32 %v153_v20, %v153_v20 }
  0xa7   :  { %v146_v14 = vpop.f32.mrf.mxu0 }
  0xa8   :  { %v147_v16 = vadd.f32 %v863_v13, %v146_v14  ;;  %v830_v14 = vld [vmem:[%s1158_s7 + $0x10] sm:$0xff] }
  0xaa   :  { %v154_v19 = vmax.f32 %v147_v16, 0.0  ;;  %v828_v16 = vld [vmem:[%s1158_s7] sm:$0xff] }
  0xac   :  { %v176_v23 = vmul.f32 %v154_v19, %v154_v19  ;;  %v166_v27 = vadd.f32 %v154_v19, %v153_v20 }
  0xae   :  { %v178_v29 = vadd.f32 %v176_v23, %v175_v26 }
  0xaf   :  { %v149_v21 = vpop.f32.mrf.mxu0 }
  0xb0   :  { %v150_v24 = vadd.f32 %v863_v13, %v149_v21  ;;  %v831_v13 = vld [vmem:[%s1158_s7 + $0x18] sm:$0xff]  ;;  %v837_v21 = vld [vmem:[%s1160_s9 + $0x28] sm:$0xff] }
  0xb1   :  { %357 = vmatpush.bf16.msra.mxu2 %v831_v13 }
  0xb2   :  { %v155_v28 = vmax.f32 %v150_v24, 0.0 }
  0xb4   :  { %v167_v30 = vadd.f32 %v166_v27, %v155_v28  ;;  %v177_v31 = vmul.f32 %v155_v28, %v155_v28 }
  0xb5   :  { %358 = vmatpush.bf16.msra.mxu2 %v830_v14 }
  0xb6   :  { %v168_v33 = vrot.slane %v167_v30, 4  ;;  %v179_v34 = vadd.f32 %v178_v29, %v177_v31  ;;  %v835_v29 = vld [vmem:[%s1160_s9 + $0x18] sm:$0xff] }
  0xb7   :  { %v151_v35 = vpop.f32.mrf.mxu0 }
  0xb8   :  { %v169_v36 = vadd.f32 %v168_v33, %v167_v30  ;;  %v180_v37 = vrot.slane %v179_v34, 4  ;;  %v834_v35 = vld [vmem:[%s1160_s9 + $0x10] sm:$0xff] }
  0xb9   :  { %359 = vmatpush.bf16.msra.mxu2 %v829_v15 }
  0xba   :  { %v170_v39 = vrot.slane %v169_v36, 2  ;;  %v181_v40 = vadd.f32 %v180_v37, %v179_v34  ;;  %v832_v37 = vld [vmem:[%s1160_s9] sm:$0xff] }
  0xbc   :  { %v171_v41 = vadd.f32 %v170_v39, %v169_v36  ;;  %v182_v42 = vrot.slane %v181_v40, 2  ;;  %v833_v36 = vld [vmem:[%s1160_s9 + $0x8] sm:$0xff]  ;;  %v843_v39 = vld [vmem:[%s1162_s11 + $0x18] sm:$0xff] }
  0xbd   :  { %360 = vmatpush.bf16.msra.mxu2 %v828_v16 }
  0xbe   :  { %v172_v44 = vrot.slane %v171_v41, 1  ;;  %v183_v45 = vadd.f32 %v182_v42, %v181_v40  ;;  %v842_v40 = vld [vmem:[%s1162_s11 + $0x10] sm:$0xff] }
  0xc0   :  { %v173_v46 = vadd.f32 %v172_v44, %v171_v41  ;;  %v184_v47 = vrot.slane %v183_v45, 1 }
  0xc1   :  { %513 = vmatpush.bf16.msrb.mxu2 %v843_v39 }
  0xc2   :  { %v174_v49 = vmul.f32 0.041666668, %v173_v46  ;;  %v185_v50 = vadd.f32 %v184_v47, %v183_v45 }
  0xc4   :  { %v186_v51 = vmul.f32 0.041666668, %v185_v50  ;;  %v187_v52 = vmul.f32 %v174_v49, %v174_v49 }
  0xc5   :  { %514 = vmatpush.bf16.msrb.mxu2 %v842_v40 }
  0xc6   :  { %v188_v53 = vsub.f32 %v186_v51, %v187_v52  ;;  %v840_v51 = vld [vmem:[%s1162_s11] sm:$0xff]  ;;  %v851_v52 = vld [vmem:[%s1164_s13 + $0x38] sm:$0xff] }
  0xc7   :  { %600 = vmatpush.bf16.msrb.mxu0 %v851_v52  ;;  %852 = vmatpush.bf16.msrb.mxu1 %v851_v52 }
  0xc8   :  { %v190_v54 = vadd.f32 1e-05, %v188_v53 }
  0xc9   :  { %515 = vmatpush.bf16.msrb.mxu2 %v841_v43 }
  0xca   :  { %869 = vrsqrt.f32 %v190_v54  ;;  %vm197_vm1 = vweird.f32 %v190_v54 }
  0xcd   :  { %516 = vmatpush.bf16.msrb.mxu2 %v840_v51 }
  0xd0   :  { %v870_v55 = vpop.eup %869 }
  0xd1   :  { %v192_v56 = vmul.f32 %v870_v55, %v190_v54  ;;  %vm198_vm0 = vweird.f32 %v870_v55  ;;  %v850_v54 = vld [vmem:[%s1164_s13 + $0x30] sm:$0xff] }
  0xd2   :  { %vm199_vm2 = vmor %vm197_vm1, %vm198_vm0  ;;  %601 = vmatpush.bf16.msrb.mxu0 %v850_v54  ;;  %853 = vmatpush.bf16.msrb.mxu1 %v850_v54 }
  0xd3   :  { %v193_v57 = vmul.f32 %v870_v55, %v192_v56  ;;  %v849_v56 = vld [vmem:[%s1164_s13 + $0x28] sm:$0xff] }
  0xd5   :  { %v194_v58 = vmul.f32 0.5, %v193_v57 }
  0xd6   :  { %602 = vmatpush.bf16.msrb.mxu0 %v849_v56  ;;  %854 = vmatpush.bf16.msrb.mxu1 %v849_v56 }
  0xd7   :  { %v195_v59 = vsub.f32 1.5, %v194_v58 }
  0xd9   :  { %v196_v61 = vmul.f32 %v870_v55, %v195_v59 }
  0xdb   :  { %v200_v62 = vsel %vm199_vm2, %v870_v55, %v196_v61  ;;  %v866_v55 = vld [vmem:[%s1161_s10] ss:$0 sm:$0xff] }
  0xdc   :  { %v201_v63 = vmul.f32 %v200_v62, %v189_v60  ;;  %v848_v60 = vld [vmem:[%s1164_s13 + $0x20] sm:$0xff] }
  0xdd   :  { %603 = vmatpush.bf16.msrb.mxu0 %v848_v60  ;;  %855 = vmatpush.bf16.msrb.mxu1 %v848_v60 }
  0xde   :  { %v203_v1 = vmul.f32 %v201_v63, %v174_v49  ;;  %v206_v2 = vperm.slane %v201_v63, 0 }
  0xe0   :  { %v204_v3 = vsub.f32 %v202_v0, %v203_v1  ;;  %v208_v4 = vmul.f32 %v206_v2, %v153_v20  ;;  %v209_v5 = vmul.f32 %v206_v2, %v154_v19  ;;  %v210_v10 = vmul.f32 %v206_v2, %v155_v28  ;;  %v838_v19 = vld [vmem:[%s1160_s9 + $0x30] sm:$0xff]  ;;  %v864_v20 = vld [vmem:[%s1157_s6] ss:$0 sm:$0xff]  ;;  %s629_s9 = sshll.u32 %s1167_s16, 4  ;;  %s630_s9 = int_to_ptr.hbm [resolvable:$true] %s629_s9 }
  0xe1   :  { %445 = vmatpush.bf16.msra.mxu3 %v838_v19 }
  0xe2   :  { %v212_v6 = vperm.slane %v204_v3, 0 }
  0xe4   :  { %v214_v7 = vadd.f32 %v212_v6, %v208_v4  ;;  %v215_v8 = vadd.f32 %v212_v6, %v209_v5  ;;  %v216_v11 = vadd.f32 %v212_v6, %v210_v10  ;;  %v847_v5 = vld [vmem:[%s1164_s13 + $0x18] sm:$0xff]  ;;  %v846_v6 = vld [vmem:[%s1164_s13 + $0x10] sm:$0xff]  ;;  %v867_v10 = vld [vmem:[%s1163_s12] ss:$0 sm:$0xff]  ;;  %s898_s12 = smov 128  }
  0xe5   :  { %446 = vmatpush.bf16.msra.mxu3 %v837_v21  ;;  %604 = vmatpush.bf16.msrb.mxu0 %v847_v5 }
  0xe6   :  { %v217_v9 = vpack.c.bf16 %v215_v8, %v214_v7  ;;  %v218_v12 = vpack.c.bf16 %v216_v11, %v216_v11  ;;  %856 = vmatpush.bf16.msrb.mxu1 %v847_v5  ;;  %v845_v7 = vld [vmem:[%s1164_s13 + $0x8] sm:$0xff]  ;;  %v844_v8 = vld [vmem:[%s1164_s13] sm:$0xff]  ;;  %s897_s13 = smov [#allocation2]  }
  0xe7   :  { %s627_s20 = sshll.u32 %s897_s13, 4  ;;  %s628_s20 = int_to_ptr.vmem [resolvable:$true] %s627_s20 }
  0xe8   :  { %295 = vmatmul.bf16.vlgmr.msra.gmra.mxu1 %v217_v9 }
  0xe9   :  { %447 = vmatpush.bf16.msra.mxu3 %v836_v25  ;;  %605 = vmatpush.bf16.msrb.mxu0 %v846_v6 }
  0xea   :  { %857 = vmatpush.bf16.msrb.mxu1 %v846_v6 }
  0xed   :  { %448 = vmatpush.bf16.msra.mxu3 %v835_v29  ;;  %606 = vmatpush.bf16.msrb.mxu0 %v845_v7 }
  0xee   :  { %858 = vmatpush.bf16.msrb.mxu1 %v845_v7 }
  0xf1   :  { %449 = vmatpush.bf16.msra.mxu3 %v834_v35  ;;  %607 = vmatpush.bf16.msrb.mxu0 %v844_v8 }
  0xf2   :  { %859 = vmatpush.bf16.msrb.mxu1 %v844_v8 }
  0xf5   :  { %450 = vmatpush.bf16.msra.mxu3 %v833_v36 }
  0xf8   :  { %300 = vmatmul.bf16.gmra.mxu1 %v218_v12 }
  0xf9   :  { %451 = vmatpush.bf16.msra.mxu3 %v832_v37 }
 0x165   :  { %v296_v18 = vpop.f32.mrf.mxu1 }
 0x166   :  { %v297_v22 = vadd.f32 %v864_v20, %v296_v18 }
 0x168   :  { %v305_v26 = vmax.f32 %v297_v22, 0.0  ;;  %v868_v22 = vld [vmem:[%s1165_s14] ss:$0 sm:$0xff] }
 0x16d   :  { %v298_v23 = vpop.f32.mrf.mxu1 }
 0x16e   :  { %v299_v24 = vadd.f32 %v864_v20, %v298_v23 }
 0x170   :  { %v306_v27 = vmax.f32 %v299_v24, 0.0 }
 0x172   :  { %v308_v28 = vpack.c.bf16 %v306_v27, %v305_v26 }
 0x174   :  { %727 = vmatmul.msk.bf16.vlgmr.msra.gmra.mxu2 %vm346_vm3, %v308_v28 }
 0x175   :  { %v301_v30 = vpop.f32.mrf.mxu1 }
 0x176   :  { %v302_v31 = vadd.f32 %v864_v20, %v301_v30 }
 0x178   :  { %v307_v33 = vmax.f32 %v302_v31, 0.0 }
 0x17a   :  { %v309_v34 = vpack.c.bf16 %v307_v33, %v307_v33 }
 0x17d   :  { %v303_v32 = vpop.f32.mrf.mxu1 }
 0x184   :  { %728 = vmatmul.msk.bf16.gmra.mxu2 %vm346_vm3, %v309_v34 }
 0x1f7   :  { %v362_v41 = vpop.f32.mrf.mxu2 }
 0x1f8   :  { %v363_v42 = vadd.f32 %v865_v38, %v362_v41 }
 0x1fa   :  { %371 = vst [vmem:[#allocation2] sm:$0xff] %v363_v42 }
 0x1ff   :  { %v364_v44 = vpop.f32.mrf.mxu2 }
 0x200   :  { %v365_v45 = vadd.f32 %v865_v38, %v364_v44 }
 0x202   :  { %372 = vst [vmem:[#allocation2 + $0x8] sm:$0xff] %v365_v45  ;;  %v374_v46 = vpack.c.bf16 %v365_v45, %v363_v42 }
 0x204   :  { %452 = vmatmul.bf16.vlgmr.msra.gmra.mxu3 %v374_v46 }
 0x207   :  { %v367_v47 = vpop.f32.mrf.mxu2 }
 0x208   :  { %v368_v48 = vadd.f32 %v865_v38, %v367_v47 }
 0x20a   :  { %373 = vst [vmem:[#allocation2 + $0x10] sm:$0xff] %v368_v48  ;;  %v375_v50 = vpack.c.bf16 %v368_v48, %v368_v48 }
 0x20b   :  { %635 = dma.vmem_to_hbm [thread:$0]  %s628_s20, 384, %s630_s9, [#allocation3], %s898_s12, %s898_s12, %s899_s8  }
 0x20f   :  { %v369_v49 = vpop.f32.mrf.mxu2 }
 0x214   :  { %457 = vmatmul.bf16.gmra.mxu3 %v375_v50 }
 0x287   :  { %v453_v53 = vpop.f32.mrf.mxu3 }
 0x288   :  { %v454_v57 = vadd.f32 %v866_v55, %v453_v53 }
 0x28a   :  { %v462_v61 = vmax.f32 %v454_v57, 0.0 }
 0x28f   :  { %v455_v58 = vpop.f32.mrf.mxu3 }
 0x290   :  { %v456_v59 = vadd.f32 %v866_v55, %v455_v58 }
 0x292   :  { %v463_v62 = vmax.f32 %v456_v59, 0.0 }
 0x294   :  { %v465_v63 = vpack.c.bf16 %v463_v62, %v462_v61 }
 0x296   :  { %777 = vmatmul.msk.bf16.vlgmr.msrb.gmra.mxu2 %vm346_vm3, %v465_v63 }
 0x297   :  { %v458_v0 = vpop.f32.mrf.mxu3 }
 0x298   :  { %v459_v1 = vadd.f32 %v866_v55, %v458_v0 }
 0x29a   :  { %v464_v3 = vmax.f32 %v459_v1, 0.0 }
 0x29c   :  { %v466_v4 = vpack.c.bf16 %v464_v3, %v464_v3 }
 0x29f   :  { %v460_v2 = vpop.f32.mrf.mxu3 }
 0x2a6   :  { %778 = vmatmul.msk.bf16.gmra.mxu2 %vm346_vm3, %v466_v4 }
 0x319   :  { %v518_v9 = vpop.f32.mrf.mxu2 }
 0x31a   :  { %v519_v11 = vadd.f32 %v867_v10, %v518_v9 }
 0x31c   :  { %v527_v14 = vmax.f32 %v519_v11, 0.0 }
 0x321   :  { %v520_v12 = vpop.f32.mrf.mxu2 }
 0x322   :  { %v521_v13 = vadd.f32 %v867_v10, %v520_v12 }
 0x324   :  { %v528_v15 = vmax.f32 %v521_v13, 0.0 }
 0x326   :  { %v530_v16 = vpack.c.bf16 %v528_v15, %v527_v14 }
 0x328   :  { %608 = vmatmul.bf16.vlgmr.msrb.gmra.mxu0 %v530_v16 }
 0x329   :  { %v523_v17 = vpop.f32.mrf.mxu2 }
 0x32a   :  { %v524_v18 = vadd.f32 %v867_v10, %v523_v17 }
 0x32c   :  { %v529_v19 = vmax.f32 %v524_v18, 0.0 }
 0x32e   :  { %v531_v20 = vpack.c.bf16 %v529_v19, %v529_v19 }
 0x330   :  { %613 = vmatmul.bf16.vlgmr.msrb.gmra.mxu1 %v531_v20 }
 0x331   :  { %v525_v21 = vpop.f32.mrf.mxu2 }
 0x3a5   :  { %v609_v23 = vpop.f32.mrf.mxu0 }
 0x3a6   :  { %v610_v24 = vadd.f32 %v868_v22, %v609_v23 }
 0x3a8   :  { %618 = vst [vmem:[%s1166_s15] sm:$0xff] %v610_v24 }
 0x3ad   :  { %v611_v25 = vpop.f32.mrf.mxu0  ;;  %v614_v26 = vpop.f32.mrf.mxu1 }
 0x3ae   :  { %v612_v27 = vadd.f32 %v868_v22, %v611_v25  ;;  %v615_v28 = vadd.f32 %v868_v22, %v614_v26 }
 0x3b0   :  { %619 = vst [vmem:[%s1166_s15 + $0x8] sm:$0xff] %v612_v27 }
 0x3b1   :  { %620 = vst [vmem:[%s1166_s15 + $0x10] sm:$0xff] %v615_v28 }
 0x3b5   :  { %v616_v29 = vpop.f32.mrf.mxu1 }
 0x3b6   :  { %895 = dma.done.wait [#allocation3], 384  }
 0x3b7   :  { %896 = vsyncadd [#allocation3], 4294966912 }
 0x3b8   :  { %642 = vsyncpa [#allocation3], 1 }

</bundles_post_ra>
